<compile_context>
chip_gen: v7x
topology: tpu7x:2x2x1
jax: 0.10.0
libtpu: 0.0.40
codegen_flags: <defaults>
</compile_context>

<pallas_src>
import jax
import jax.numpy as jnp
from jax.experimental import pallas as pl
from jax.experimental.pallas import tpu as pltpu


# ----------------------------------------------------------------------------
# Fused kernel: 1x1 conv (+bias) -> x8 nearest upsample, plus the fc head.
# One grid step == one batch element.
# ----------------------------------------------------------------------------
def _make_fused_kernel(c_out, h, w):
    def kernel(xf_ref, wc_ref, bconv_ref, u_ref, ut_ref,
               y_ref, wfct_ref, bfc_ref, ox_ref, oy_ref):
        # xf_ref   : (1, c_in, h*w)   VMEM  -- one batch of x_feat, lane-dense
        # wc_ref   : (c_out, c_in)    VMEM  -- 1x1 conv weight
        # bconv_ref: (c_out,)         SMEM  -- conv bias scalars
        # u_ref    : (scale*h, h)     VMEM  -- 0/1 row-upsample selector
        # ut_ref   : (w, scale*w)     VMEM  -- 0/1 column-upsample selector
        # y_ref    : (1, 1, d_fc)     VMEM  -- one batch of y_feat
        # wfct_ref : (d_fc, c_out)    VMEM  -- fc weight, transposed
        # bfc_ref  : (1, c_out)       VMEM
        # ox_ref   : (1, c_out, scale*h, scale*w)  VMEM out (lane-dense)
        # oy_ref   : (1, 1, c_out)                 VMEM out
        xf = xf_ref[0]                                              # (c_in, h*w)

        # 1x1 conv as a single MXU matmul: (c_out, c_in) @ (c_in, h*w).
        conv = jnp.dot(wc_ref[...], xf,
                       preferred_element_type=jnp.float32)          # (c_out, h*w)
        conv3 = conv.reshape(c_out, h, w)                           # tiny value reshape

        u = u_ref[...]                                              # (ho, h)
        ut = ut_ref[...]                                            # (w, wo)

        # Per output channel (c_out == 2, static unroll): bias + x8 nearest upsample.
        # Column-upsample first so both matmuls have 128-wide (lane-dense) outputs.
        for o in range(c_out):
            co = conv3[o] + bconv_ref[o]                            # (h, w) + SMEM scalar
            t = jnp.dot(co, ut, preferred_element_type=jnp.float32)  # (h, wo)
            ox_ref[0, o] = jnp.dot(u, t,
                                   preferred_element_type=jnp.float32
                                   ).astype(ox_ref.dtype)            # (ho, wo)

        # fc head for this batch element only (keeps every output per-batch so the
        # grid axis can be "parallel" across TensorCores on v7x).
        oy = jnp.dot(y_ref[0], wfct_ref[...],
                     preferred_element_type=jnp.float32) + bfc_ref[...]
        oy_ref[0] = oy.astype(oy_ref.dtype)

    return kernel


# ----------------------------------------------------------------------------
# Wrapper (single pallas_call; only tiny parameter-shaped prep in XLA)
# ----------------------------------------------------------------------------
def network_forward(x_feat, y_feat, z, x1, params):
    """Pallas implementation of network.forward given the feature-extractor outputs.

    x_feat: (N, 128, H, W) -> output_layer (1x1 conv, 128 -> 2), then x8 nearest upsample
    y_feat: (N, 512)       -> fc (512 -> 2)
    z, x1 : passed through unchanged.
    """
    w_conv, b_conv, w_fc, b_fc = (
        params["w_conv"], params["b_conv"], params["w_fc"], params["b_fc"]
    )
    n, c_in, h, w = x_feat.shape
    c_out = w_conv.shape[0]
    scale = 8
    d_fc = y_feat.shape[1]
    ho, wo = scale * h, scale * w
    dt = x_feat.dtype

    # Free (metadata-only) reshapes: no transpose, no copy.
    xf = x_feat.reshape(n, c_in, h * w)          # (N, 128, 256) -- lane-dense rows
    yf = y_feat.reshape(n, 1, d_fc)              # (N, 1, 512)

    wc = w_conv.reshape(c_out, c_in)             # (2, 128)
    w_fc_t = w_fc.T                              # (512, 2) -- tiny parameter transpose
    b_fc_row = b_fc.reshape(1, c_out)

    # Exact 0/1 nearest-neighbour selectors, built once (tiny, grid-invariant inputs).
    u = (jnp.arange(ho, dtype=jnp.int32)[:, None] // scale ==
         jnp.arange(h, dtype=jnp.int32)[None, :]).astype(dt)          # (ho, h)
    ut = (jnp.arange(w, dtype=jnp.int32)[:, None] ==
          jnp.arange(wo, dtype=jnp.int32)[None, :] // scale).astype(dt)  # (w, wo)

    kernel = _make_fused_kernel(c_out, h, w)

    out_x, out_y = pl.pallas_call(
        kernel,
        out_shape=(
            jax.ShapeDtypeStruct((n, c_out, ho, wo), dt),
            jax.ShapeDtypeStruct((n, 1, c_out), dt),
        ),
        grid=(n,),
        in_specs=[
            pl.BlockSpec((1, c_in, h * w), lambda i: (i, 0, 0)),        # xf (per batch)
            pl.BlockSpec((c_out, c_in), lambda i: (0, 0)),              # conv weight
            pl.BlockSpec(memory_space=pltpu.MemorySpace.SMEM),          # conv bias scalars
            pl.BlockSpec((ho, h), lambda i: (0, 0)),                    # U   (row upsample)
            pl.BlockSpec((w, wo), lambda i: (0, 0)),                    # U^T (col upsample)
            pl.BlockSpec((1, 1, d_fc), lambda i: (i, 0, 0)),            # y_feat (per batch)
            pl.BlockSpec((d_fc, c_out), lambda i: (0, 0)),              # w_fc^T
            pl.BlockSpec((1, c_out), lambda i: (0, 0)),                 # b_fc row
        ],
        out_specs=(
            pl.BlockSpec((1, c_out, ho, wo), lambda i: (i, 0, 0, 0)),   # upsampled conv
            pl.BlockSpec((1, 1, c_out), lambda i: (i, 0, 0)),           # fc output (per batch)
        ),
        compiler_params=pltpu.CompilerParams(
            dimension_semantics=("parallel",),
        ),
    )(xf, wc, b_conv, u, ut, yf, w_fc_t, b_fc_row)

    return out_x, out_y.reshape(n, c_out), z, x1


# ----------------------------------------------------------------------------
# Pure-JAX reference (for correctness check)
# ----------------------------------------------------------------------------
def network_forward_ref(x_feat, y_feat, z, x1, params):
    w_conv, b_conv, w_fc, b_fc = (
        params["w_conv"], params["b_conv"], params["w_fc"], params["b_fc"]
    )
    conv = jnp.einsum("oc,nchw->nohw", w_conv.reshape(w_conv.shape[0], -1), x_feat)
    conv = conv + b_conv[None, :, None, None]
    x_up = jnp.repeat(jnp.repeat(conv, 8, axis=2), 8, axis=3)
    y_out = y_feat @ w_fc.T + b_fc
    return x_up, y_out, z, x1


# ----------------------------------------------------------------------------
# Main
# ----------------------------------------------------------------------------
if __name__ == "__main__":
    key = jax.random.PRNGKey(0)
    k_x, k_y, k_z, k_x1, k_wc, k_wf, k_bf = jax.random.split(key, 7)

    # Feature-extractor outputs (the inputs to this module's own compute).
    Nb, Cin, H, W = 2, 128, 16, 16
    x_feat = jax.random.normal(k_x, (Nb, Cin, H, W), dtype=jnp.float32)
    y_feat = jax.random.normal(k_y, (Nb, 512), dtype=jnp.float32)
    z = jax.random.normal(k_z, (Nb, 64, 8, 8), dtype=jnp.float32)       # pass-through
    x1 = jax.random.normal(k_x1, (Nb, 256, 4, 4), dtype=jnp.float32)    # pass-through

    # Parameters (matching the module's __init__ shapes):
    #   output_layer: Conv2d(128, 2, k=1) -> weight (2, 128, 1, 1) ~ N(0, 0.01), bias = 0
    #   fc: Linear(512, 2)               -> weight (2, 512), bias (2,)
    params = {
        "w_conv": 0.01 * jax.random.normal(k_wc, (2, Cin, 1, 1), dtype=jnp.float32),
        "b_conv": jnp.zeros((2,), dtype=jnp.float32),
        "w_fc": 0.05 * jax.random.normal(k_wf, (2, 512), dtype=jnp.float32),
        "b_fc": 0.01 * jax.random.normal(k_bf, (2,), dtype=jnp.float32),
    }

    out = jax.jit(network_forward)(x_feat, y_feat, z, x1, params)
    out = jax.block_until_ready(out)
    ref = network_forward_ref(x_feat, y_feat, z, x1, params)

    for o, r in zip(out, ref):
        assert o.shape == r.shape and o.dtype == r.dtype
        assert jnp.max(jnp.abs(o - r)) < 1e-4, "mismatch vs reference"

    # TODO(synk): the external `feature_extractor` backbone is not specified in the
    # module, so it is treated as an upstream producer of (x, y, z, x1) rather than
    # being implemented here.
    print("KERNEL_OK")
</pallas_src>

<mosaic_0001>
module attributes {stable_mosaic.version = 11 : i64} {
  func.func @kernel(%arg0: i32, %arg1: memref<1x128x256xf32, #tpu.memory_space<vmem>>, %arg2: memref<2x128xf32, #tpu.memory_space<vmem>>, %arg3: memref<2xf32, #tpu.memory_space<smem>>, %arg4: memref<128x16xf32, #tpu.memory_space<vmem>>, %arg5: memref<16x128xf32, #tpu.memory_space<vmem>>, %arg6: memref<1x1x512xf32, #tpu.memory_space<vmem>>, %arg7: memref<512x2xf32, #tpu.memory_space<vmem>>, %arg8: memref<1x2xf32, #tpu.memory_space<vmem>>, %arg9: memref<1x2x128x128xf32, #tpu.memory_space<vmem>>, %arg10: memref<1x1x2xf32, #tpu.memory_space<vmem>>) attributes {dimension_semantics = [#tpu.dimension_semantics<parallel>], iteration_bounds = array<i64: 2>, scalar_prefetch = 0 : i64, scratch_operands = 0 : i64, tpu.core_type = #tpu.core_type<tc>, window_params = [{transform_indices = @transform_0, window_bounds = array<i64: 1, 128, 256>}, {pipeline_mode = #tpu.pipeline_mode<synchronous>, transform_indices = @transform_1, window_bounds = array<i64: 2, 128>}, {transform_indices = @transform_2, window_bounds = array<i64: 2>}, {pipeline_mode = #tpu.pipeline_mode<synchronous>, transform_indices = @transform_3, window_bounds = array<i64: 128, 16>}, {pipeline_mode = #tpu.pipeline_mode<synchronous>, transform_indices = @transform_4, window_bounds = array<i64: 16, 128>}, {transform_indices = @transform_5, window_bounds = array<i64: 1, 1, 512>}, {pipeline_mode = #tpu.pipeline_mode<synchronous>, transform_indices = @transform_6, window_bounds = array<i64: 512, 2>}, {pipeline_mode = #tpu.pipeline_mode<synchronous>, transform_indices = @transform_7, window_bounds = array<i64: 1, 2>}, {transform_indices = @transform_8, window_bounds = array<i64: 1, 2, 128, 128>}, {transform_indices = @transform_9, window_bounds = array<i64: 1, 1, 2>}]} {
    %c0 = arith.constant 0 : index
    %c0_0 = arith.constant 0 : index
    %c0_1 = arith.constant 0 : index
    %0 = vector.load %arg1[%c0, %c0_0, %c0_1] : memref<1x128x256xf32, #tpu.memory_space<vmem>>, vector<1x128x256xf32>
    %1 = vector.shape_cast %0 : vector<1x128x256xf32> to vector<128x256xf32>
    %c0_2 = arith.constant 0 : index
    %c0_3 = arith.constant 0 : index
    %2 = vector.load %arg2[%c0_2, %c0_3] : memref<2x128xf32, #tpu.memory_space<vmem>>, vector<2x128xf32>
    %cst = arith.constant dense<0.000000e+00> : vector<2x256xf32>
    %3 = tpu.matmul %2, %1, %cst {dimension_numbers = #tpu.dot_dimension_numbers<[1], [0], [0], [1], [0, 0, 1, 1], [], []>} : vector<2x128xf32>, vector<128x256xf32>, vector<2x256xf32> -> vector<2x256xf32>
    %4 = vector.shape_cast %3 : vector<2x256xf32> to vector<2x16x16xf32>
    %c0_4 = arith.constant 0 : index
    %c0_5 = arith.constant 0 : index
    %5 = vector.load %arg4[%c0_4, %c0_5] : memref<128x16xf32, #tpu.memory_space<vmem>>, vector<128x16xf32>
    %c0_6 = arith.constant 0 : index
    %c0_7 = arith.constant 0 : index
    %6 = vector.load %arg5[%c0_6, %c0_7] : memref<16x128xf32, #tpu.memory_space<vmem>>, vector<16x128xf32>
    %7 = vector.extract_strided_slice %4 {offsets = [0, 0, 0], sizes = [1, 16, 16], strides = [1, 1, 1]} : vector<2x16x16xf32> to vector<1x16x16xf32>
    %8 = vector.shape_cast %7 : vector<1x16x16xf32> to vector<16x16xf32>
    %c0_8 = arith.constant 0 : index
    %9 = memref.load %arg3[%c0_8] : memref<2xf32, #tpu.memory_space<smem>>
    %10 = vector.broadcast %9 : f32 to vector<16x16xf32>
    %11 = arith.addf %8, %10 : vector<16x16xf32>
    %cst_9 = arith.constant dense<0.000000e+00> : vector<16x128xf32>
    %12 = tpu.matmul %11, %6, %cst_9 {dimension_numbers = #tpu.dot_dimension_numbers<[1], [0], [0], [1], [0, 0, 1, 1], [], []>} : vector<16x16xf32>, vector<16x128xf32>, vector<16x128xf32> -> vector<16x128xf32>
    %cst_10 = arith.constant dense<0.000000e+00> : vector<128x128xf32>
    %13 = tpu.matmul %5, %12, %cst_10 {dimension_numbers = #tpu.dot_dimension_numbers<[1], [0], [0], [1], [0, 0, 1, 1], [], []>} : vector<128x16xf32>, vector<16x128xf32>, vector<128x128xf32> -> vector<128x128xf32>
    %c0_11 = arith.constant 0 : index
    %c0_12 = arith.constant 0 : index
    %c0_13 = arith.constant 0 : index
    %c0_14 = arith.constant 0 : index
    %14 = vector.load %arg9[%c0_11, %c0_12, %c0_13, %c0_14] : memref<1x2x128x128xf32, #tpu.memory_space<vmem>>, vector<1x1x128x128xf32>
    %15 = vector.shape_cast %14 : vector<1x1x128x128xf32> to vector<128x128xf32>
    %16 = vector.shape_cast %13 : vector<128x128xf32> to vector<1x1x128x128xf32>
    tpu.vector_store %arg9[%c0_11, %c0_12, %c0_13, %c0_14], %16 {strides = array<i32>} : memref<1x2x128x128xf32, #tpu.memory_space<vmem>>, vector<1x1x128x128xf32>,
    %17 = vector.extract_strided_slice %4 {offsets = [1, 0, 0], sizes = [1, 16, 16], strides = [1, 1, 1]} : vector<2x16x16xf32> to vector<1x16x16xf32>
    %18 = vector.shape_cast %17 : vector<1x16x16xf32> to vector<16x16xf32>
    %c1 = arith.constant 1 : index
    %19 = memref.load %arg3[%c1] : memref<2xf32, #tpu.memory_space<smem>>
    %20 = vector.broadcast %19 : f32 to vector<16x16xf32>
    %21 = arith.addf %18, %20 : vector<16x16xf32>
    %cst_15 = arith.constant dense<0.000000e+00> : vector<16x128xf32>
    %22 = tpu.matmul %21, %6, %cst_15 {dimension_numbers = #tpu.dot_dimension_numbers<[1], [0], [0], [1], [0, 0, 1, 1], [], []>} : vector<16x16xf32>, vector<16x128xf32>, vector<16x128xf32> -> vector<16x128xf32>
    %cst_16 = arith.constant dense<0.000000e+00> : vector<128x128xf32>
    %23 = tpu.matmul %5, %22, %cst_16 {dimension_numbers = #tpu.dot_dimension_numbers<[1], [0], [0], [1], [0, 0, 1, 1], [], []>} : vector<128x16xf32>, vector<16x128xf32>, vector<128x128xf32> -> vector<128x128xf32>
    %c0_17 = arith.constant 0 : index
    %c1_18 = arith.constant 1 : index
    %c0_19 = arith.constant 0 : index
    %c0_20 = arith.constant 0 : index
    %24 = vector.load %arg9[%c0_17, %c1_18, %c0_19, %c0_20] : memref<1x2x128x128xf32, #tpu.memory_space<vmem>>, vector<1x1x128x128xf32>
    %25 = vector.shape_cast %24 : vector<1x1x128x128xf32> to vector<128x128xf32>
    %26 = vector.shape_cast %23 : vector<128x128xf32> to vector<1x1x128x128xf32>
    tpu.vector_store %arg9[%c0_17, %c1_18, %c0_19, %c0_20], %26 {strides = array<i32>} : memref<1x2x128x128xf32, #tpu.memory_space<vmem>>, vector<1x1x128x128xf32>,
    %c0_21 = arith.constant 0 : index
    %c0_22 = arith.constant 0 : index
    %c0_23 = arith.constant 0 : index
    %27 = vector.load %arg6[%c0_21, %c0_22, %c0_23] : memref<1x1x512xf32, #tpu.memory_space<vmem>>, vector<1x1x512xf32>
    %28 = vector.shape_cast %27 : vector<1x1x512xf32> to vector<1x512xf32>
    %c0_24 = arith.constant 0 : index
    %c0_25 = arith.constant 0 : index
    %29 = vector.load %arg7[%c0_24, %c0_25] : memref<512x2xf32, #tpu.memory_space<vmem>>, vector<512x2xf32>
    %cst_26 = arith.constant dense<0.000000e+00> : vector<1x2xf32>
    %30 = tpu.matmul %28, %29, %cst_26 {dimension_numbers = #tpu.dot_dimension_numbers<[1], [0], [0], [1], [0, 0, 1, 1], [], []>} : vector<1x512xf32>, vector<512x2xf32>, vector<1x2xf32> -> vector<1x2xf32>
    %c0_27 = arith.constant 0 : index
    %c0_28 = arith.constant 0 : index
    %31 = vector.load %arg8[%c0_27, %c0_28] : memref<1x2xf32, #tpu.memory_space<vmem>>, vector<1x2xf32>
    %32 = arith.addf %30, %31 : vector<1x2xf32>
    %c0_29 = arith.constant 0 : index
    %c0_30 = arith.constant 0 : index
    %c0_31 = arith.constant 0 : index
    %33 = vector.load %arg10[%c0_29, %c0_30, %c0_31] : memref<1x1x2xf32, #tpu.memory_space<vmem>>, vector<1x1x2xf32>
    %34 = vector.shape_cast %33 : vector<1x1x2xf32> to vector<1x2xf32>
    %35 = vector.shape_cast %32 : vector<1x2xf32> to vector<1x1x2xf32>
    tpu.vector_store %arg10[%c0_29, %c0_30, %c0_31], %35 {strides = array<i32>} : memref<1x1x2xf32, #tpu.memory_space<vmem>>, vector<1x1x2xf32>,
    return
  }
  func.func @transform_0(%arg0: i32) -> (i32, i32, i32) {
    %c0_i32 = arith.constant 0 : i32
    %c0_i32_0 = arith.constant 0 : i32
    %c0_i32_1 = arith.constant 0 : i32
    return %arg0, %c0_i32, %c0_i32_0 : i32, i32, i32
  }
  func.func @transform_1(%arg0: i32) -> (i32, i32) {
    %c0_i32 = arith.constant 0 : i32
    %c0_i32_0 = arith.constant 0 : i32
    %c0_i32_1 = arith.constant 0 : i32
    return %c0_i32, %c0_i32_0 : i32, i32
  }
  func.func @transform_2(%arg0: i32) -> i32 {
    %c0_i32 = arith.constant 0 : i32
    %c0_i32_0 = arith.constant 0 : i32
    return %c0_i32 : i32
  }
  func.func @transform_3(%arg0: i32) -> (i32, i32) {
    %c0_i32 = arith.constant 0 : i32
    %c0_i32_0 = arith.constant 0 : i32
    %c0_i32_1 = arith.constant 0 : i32
    return %c0_i32, %c0_i32_0 : i32, i32
  }
  func.func @transform_4(%arg0: i32) -> (i32, i32) {
    %c0_i32 = arith.constant 0 : i32
    %c0_i32_0 = arith.constant 0 : i32
    %c0_i32_1 = arith.constant 0 : i32
    return %c0_i32, %c0_i32_0 : i32, i32
  }
  func.func @transform_5(%arg0: i32) -> (i32, i32, i32) {
    %c0_i32 = arith.constant 0 : i32
    %c0_i32_0 = arith.constant 0 : i32
    %c0_i32_1 = arith.constant 0 : i32
    return %arg0, %c0_i32, %c0_i32_0 : i32, i32, i32
  }
  func.func @transform_6(%arg0: i32) -> (i32, i32) {
    %c0_i32 = arith.constant 0 : i32
    %c0_i32_0 = arith.constant 0 : i32
    %c0_i32_1 = arith.constant 0 : i32
    return %c0_i32, %c0_i32_0 : i32, i32
  }
  func.func @transform_7(%arg0: i32) -> (i32, i32) {
    %c0_i32 = arith.constant 0 : i32
    %c0_i32_0 = arith.constant 0 : i32
    %c0_i32_1 = arith.constant 0 : i32
    return %c0_i32, %c0_i32_0 : i32, i32
  }
  func.func @transform_8(%arg0: i32) -> (i32, i32, i32, i32) {
    %c0_i32 = arith.constant 0 : i32
    %c0_i32_0 = arith.constant 0 : i32
    %c0_i32_1 = arith.constant 0 : i32
    %c0_i32_2 = arith.constant 0 : i32
    return %arg0, %c0_i32, %c0_i32_0, %c0_i32_1 : i32, i32, i32, i32
  }
  func.func @transform_9(%arg0: i32) -> (i32, i32, i32) {
    %c0_i32 = arith.constant 0 : i32
    %c0_i32_0 = arith.constant 0 : i32
    %c0_i32_1 = arith.constant 0 : i32
    return %arg0, %c0_i32, %c0_i32_0 : i32, i32, i32
  }
}

</mosaic_0001>

<bundles_post_ra>
// kernel: network_forward.1
= control target key start
LH: loop header
LB: loop body
LE: loop exit
PB: predicated region body
PF: predicated region fallthrough
CT: control target
= control target key end

     0   :  { %15 = vsyncpa [#allocation4], 0  ;;  %s2711_s0 = inlined_call_operand.vmem [shape: f32[2,128,256], index: 0, kind: input, shape index: {}]   ;;  %s2712_s1 = inlined_call_operand.vmem [shape: f32[2,128], index: 1, kind: input, shape index: {}]   ;;  %s2713_s2 = inlined_call_operand.vmem [shape: f32[2], index: 2, kind: input, shape index: {}]   ;;  %s2714_s3 = inlined_call_operand.vmem [shape: f32[128,16], index: 3, kind: input, shape index: {}]   ;;  %s2715_s4 = inlined_call_operand.vmem [shape: f32[16,128], index: 4, kind: input, shape index: {}]   ;;  %s2716_s5 = inlined_call_operand.vmem [shape: f32[2,1,512], index: 5, kind: input, shape index: {}]   ;;  %s2717_s6 = inlined_call_operand.vmem [shape: f32[512,2], index: 6, kind: input, shape index: {}]   ;;  %s2718_s7 = inlined_call_operand.vmem [shape: f32[1,2], index: 7, kind: input, shape index: {}]   ;;  %s2719_s8 = inlined_call_operand.hbm [shape: f32[2,2,128,128], index: 8, kind: output, shape index: {0}]   ;;  %s2720_s9 = inlined_call_operand.hbm [shape: f32[2,1,2], index: 9, kind: output, shape index: {1}]  }
   0x1   :  { %16 = vsyncpa [#allocation3], 0 }
   0x2   :  { %18 = vsyncpa [#allocation3 + $0x1], 0 }
   0x3   :  { %19 = vsyncpa [#allocation7], 0 }
   0x4   :  { %21 = vsyncpa [#allocation7 + $0x1], 0  ;;  %s2168_s30 = smov 0   ;;  %s2170_s10 = smov 0  }
   0x5   :  { %s2172_s11 = smov 0   ;;  %s2174_s12 = smov 0  }
   0x6 LB: > { %s2189_s13 = sadd.s32 4294967295, %s2101_s12   ;;  %s1554_s14 = sadd.s32 4294967294, %s2101_s12   ;;  %s2101_s12 = sphi %s2174_s12, %s2727_s12   ;;  %s2097_s11 = sphi %s2172_s11, %s2726_s11   ;;  %s2093_s10 = sphi %s2170_s10, %s2725_s10   ;;  %s2089_s30 = sphi %s2168_s30, %s2724_s30  }
   0x7   : > { %s2193_s15 = sadd.s32 1, %s2101_s12   ;;  %s212_s16 = sadd.s32 1, %s2097_s11 }
   0x8   : > { %s209_s17 = ssub.s32 %s2101_s12, %s2193_s15  ;;  %p222_p0 = scmp.ne.s32.totalorder %s2097_s11, %s2093_s10 }
   0x9   : > { %p210_p1 = scmp.eq.s32.totalorder %s209_s17, 0  ;;  %p223_p2 = scmp.eq.s32.totalorder %s2189_s13, 1 }
   0xa   : > { %p228_p3 = scmp.ne.s32.totalorder %s2093_s10, %s2089_s30  ;;  %p229_p4 = scmp.eq.s32.totalorder %s1554_s14, 1 }
   0xb   : > { %s2204_s18 = scalar_select %p210_p1, %s2097_s11, %s212_s16  }
   0xc   : > { %p2206_p5 = por %p223_p2, %p222_p0  ;;  %p2210_p6 = por %p229_p4, %p228_p3 }
   0xd   : > { %p1555_p7 = scmp.ge.s32.totalorder %s2101_s12, 1  ;;  %p262_p8 = scmp.lt.s32.totalorder %s2101_s12, 3 }
   0xe   : > { %p1940_p9 = scmp.eq.s32.totalorder %s2189_s13, 0  ;;  %s278_s24 = sshll.u32 %s2713_s2, 4  ;;  %s279_s24 = int_to_ptr.vmem [resolvable:$true] %s278_s24 }
   0xf   : > { %p2217_p10 = pnand %p1555_p7, %p262_p8  ;;  %s1988_s25 = scalar_lea.vmem %s279_s24, 16 }
  0x10   : > { %p1989_p13 = scmp.ne.s32.totalorder %s279_s24, %s1988_s25  ;;  %p1996_p3 = scmp.lt.s32.totalorder %s279_s24, %s279_s24 }
  0x11   : > { %p1929_p11 = pneg %p2217_p10  ;;  %p1997_p4 = scmp.lt.s32.totalorder %s1988_s25, %s1988_s25 }
  0x13   : > { %p1930_p12 = pnand %p1940_p9, %p1929_p11  ;;  %p1998_p7 = por %p1997_p4, %p1996_p3 }
  0x15   : > { %p1990_p0 = pneg %p1930_p12 }
  0x17   : > { %p1991_p1 = pnand %p1990_p0, %p1989_p13 }
  0x19   : > { %p1992_p2 = pneg %p1991_p1 }
  0x1b   : > { %p1999_p8 = pnand %p1998_p7, %p1992_p2 }
  0x1d   : > { %2002 = shalt.err (!%p1999_p8)
}
  0x1e   : > { %s2103_s26 = smov [#allocation2]   ;;  %318 = sbr.rel (%p2217_p10) target bundleno = 944 (0x3b0), region = 52 }
  0x1f   : > { %1932 = dma.vmem_to_smem (!%p1930_p12), %s279_s24, 16, %s2103_s26, [#allocation4]  }
  0x25   : > { %2076 = dma.done.wait (%p1940_p9), [#allocation4], 16  }
  0x26   : > { %2078 = vsyncadd (%p1940_p9), [#allocation4], 4294967280 }
  0x27   : > { %324 = sfence }
  0x28   : > { %p363_p11 = scmp.lt.s32.totalorder %s2189_s13, 1  ;;  %v2104_v0 = vmov 0.0   ;;  %v404_v49 = vld [vmem:[%s2712_s1] sm:$0x3]  ;;  %s2105_s22 = smov 80   ;;  %v637_v53 = vld [vmem:[%s2715_s4 + $0x8] sm:$0xff]  ;;  %v524_v59 = vlaneseq }
  0x29   : > { %469 = vmatprep.mubr.f32.mxu0 %v2104_v0  ;;  %s2106_s23 = smov 112   ;;  %s2107_s24 = smov 64   ;;  %v636_v52 = vld [vmem:[%s2715_s4] sm:$0xff]  ;;  %v2112_v57 = vmov 1983009808   ;;  %vm642_vm0 = vcmask 130048  }
  0x2a   : > { %s2236_s27 = scalar_select %p363_p11, %s2189_s13, 1  ;;  %v1841_v54 = vpack.c.bf16 %v637_v53, %v636_v52  ;;  %v522_v58 = vunpack.c.l.s4 %v2112_v57  ;;  %v2294_v63 = vshrl.u32 %v524_v59, 7  ;;  %v1229_v52 = vld [vmem:[%s2717_s6 + $0x180] sm:$0xff]  ;;  %v1230_v53 = vld [vmem:[%s2717_s6 + $0x188] sm:$0xff] }
  0x2b   : > { %s2108_s25 = smov 96   ;;  %s2109_s26 = smov 32  }
  0x2c   : > { %s1623_s28 = sshll.u32 %s2236_s27, 8  ;;  %s2111_s29 = smov 16   ;;  %1842 = vmatprep.subr.bf16.mxu1 %v1841_v54  ;;  %v523_v62 = vunpack.c.0.s8 %v522_v58 }
  0x2d   : > { %s2242_s16 = scalar_lea.vmem %s2711_s0, %s1623_s28  ;;  %s2110_s28 = smov 48   ;;  %1844 = vmatpush3.bf16.msra.mxu1 %v1841_v54 }
  0x2e   : > { %v373_v1 = vld [vmem:[%s2242_s16 + $0x8] sm:$0xff]  ;;  %v375_v2 = vld [vmem:[%s2242_s16 + $0x18] sm:$0xff]  ;;  %v372_v3 = vld [vmem:[%s2242_s16] sm:$0xff]  ;;  %s1563_s14 = sshll.u32 %s2236_s27, 2 }
  0x2f   : > { %v1809_v4 = vpack.c.bf16 %v375_v2, %v373_v1  ;;  %v374_v5 = vld [vmem:[%s2242_s16 + $0x10] sm:$0xff]  ;;  %v377_v6 = vld [vmem:[%s2242_s16 + $0x28] sm:$0xff]  ;;  %v379_v7 = vld [vmem:[%s2242_s16 + $0x38] sm:$0xff]  ;;  %v2113_v1 = vmov 1934713408  }
  0x30   : > { %v1811_v8 = vpack.c.bf16 %v374_v5, %v372_v3  ;;  %v1813_v9 = vpack.c.bf16 %v379_v7, %v377_v6  ;;  %v376_v10 = vld [vmem:[%s2242_s16 + $0x20] sm:$0xff]  ;;  %v378_v11 = vld [vmem:[%s2242_s16 + $0x30] sm:$0xff]  ;;  %v381_v12 = vld [vmem:[%s2242_s16 + $0x48] sm:$0xff]  ;;  %v554_v2 = vunpack.c.l.s4 %v2113_v1  ;;  %v526_v5 = vsub.s32 %v523_v62, %v2294_v63 }
  0x31   : > { %1810 = vmatprep.subr.bf16.mxu0 %v1809_v4  ;;  %v383_v13 = vld [vmem:[%s2242_s16 + $0x58] sm:$0xff]  ;;  %v1815_v14 = vpack.c.bf16 %v378_v11, %v376_v10  ;;  %v380_v16 = vld [vmem:[%s2242_s16 + $0x40] sm:$0xff]  ;;  %v382_v17 = vld [vmem:[%s2242_s16 + $0x50] sm:$0xff] }
  0x32   : > { %1812 = vmatpush1.bf16.msra.mxu0 %v1811_v8  ;;  %v1817_v15 = vpack.c.bf16 %v383_v13, %v381_v12  ;;  %v385_v18 = vld [vmem:[%s2242_s16 + $0x68] sm:$0xff]  ;;  %v387_v19 = vld [vmem:[%s2242_s16 + $0x78] sm:$0xff]  ;;  %v1819_v20 = vpack.c.bf16 %v382_v17, %v380_v16  ;;  %v384_v22 = vld [vmem:[%s2242_s16 + $0x60] sm:$0xff] }
  0x33   : > { %1814 = vmatprep.subr.bf16.mxu0 %v1813_v9  ;;  %v1821_v21 = vpack.c.bf16 %v387_v19, %v385_v18  ;;  %v386_v23 = vld [vmem:[%s2242_s16 + $0x70] sm:$0xff]  ;;  %v389_v24 = vld [vmem:[%s2242_s16 + $0x88] sm:$0xff]  ;;  %v391_v25 = vld [vmem:[%s2242_s16 + $0x98] sm:$0xff]  ;;  %v555_v9 = vunpack.c.0.s8 %v554_v2 }
  0x34   : > { %v1823_v26 = vpack.c.bf16 %v386_v23, %v384_v22  ;;  %v1825_v27 = vpack.c.bf16 %v391_v25, %v389_v24  ;;  %v388_v28 = vld [vmem:[%s2242_s16 + $0x80] sm:$0xff]  ;;  %v390_v29 = vld [vmem:[%s2242_s16 + $0x90] sm:$0xff]  ;;  %v393_v30 = vld [vmem:[%s2242_s16 + $0xa8] sm:$0xff] }
  0x35   : > { %v395_v31 = vld [vmem:[%s2242_s16 + $0xb8] sm:$0xff]  ;;  %v1827_v32 = vpack.c.bf16 %v390_v29, %v388_v28  ;;  %v392_v34 = vld [vmem:[%s2242_s16 + $0xa0] sm:$0xff]  ;;  %v394_v35 = vld [vmem:[%s2242_s16 + $0xb0] sm:$0xff]  ;;  %v558_v17 = vsub.s32 %v555_v9, %v2294_v63 }
  0x36   : > { %1816 = vmatpush1.bf16.msra.mxu0 %v1815_v14  ;;  %v1829_v33 = vpack.c.bf16 %v395_v31, %v393_v30  ;;  %v397_v36 = vld [vmem:[%s2242_s16 + $0xc8] sm:$0xff]  ;;  %v399_v37 = vld [vmem:[%s2242_s16 + $0xd8] sm:$0xff]  ;;  %v1831_v38 = vpack.c.bf16 %v394_v35, %v392_v34  ;;  %v396_v40 = vld [vmem:[%s2242_s16 + $0xc0] sm:$0xff] }
  0x37   : > { %1818 = vmatprep.subr.bf16.mxu0 %v1817_v15  ;;  %v1833_v39 = vpack.c.bf16 %v399_v37, %v397_v36  ;;  %v398_v41 = vld [vmem:[%s2242_s16 + $0xd0] sm:$0xff]  ;;  %v401_v42 = vld [vmem:[%s2242_s16 + $0xe8] sm:$0xff]  ;;  %v403_v43 = vld [vmem:[%s2242_s16 + $0xf8] sm:$0xff] }
  0x38   : > { %v1835_v44 = vpack.c.bf16 %v398_v41, %v396_v40  ;;  %v1837_v45 = vpack.c.bf16 %v403_v43, %v401_v42  ;;  %v400_v46 = vld [vmem:[%s2242_s16 + $0xe0] sm:$0xff]  ;;  %v402_v47 = vld [vmem:[%s2242_s16 + $0xf0] sm:$0xff]  ;;  %v1182_v62 = vld [vmem:[%s2717_s6 + $0x8] sm:$0xff] }
  0x39   : > { %v1839_v48 = vpack.c.bf16 %v402_v47, %v400_v46  ;;  %v1213_v1 = vld [vmem:[%s2717_s6 + $0x100] sm:$0xff]  ;;  %v1214_v2 = vld [vmem:[%s2717_s6 + $0x108] sm:$0xff]  ;;  %v622_v9 = vld [vmem:[%s2714_s3 + $0x10] sm:$0xff] }
  0x3a   : > { %1820 = vmatpush1.bf16.msra.mxu0 %v1819_v20 }
  0x3b   : > { %1822 = vmatprep.subr.bf16.mxu0 %v1821_v21 }
  0x3e   : > { %1824 = vmatpush1.bf16.msra.mxu0 %v1823_v26 }
  0x3f   : > { %1826 = vmatprep.subr.bf16.mxu0 %v1825_v27 }
  0x42   : > { %1828 = vmatpush1.bf16.msra.mxu0 %v1827_v32 }
  0x43   : > { %1830 = vmatprep.subr.bf16.mxu0 %v1829_v33 }
  0x46   : > { %1832 = vmatpush1.bf16.msra.mxu0 %v1831_v38 }
  0x47   : > { %1834 = vmatprep.subr.bf16.mxu0 %v1833_v39 }
  0x4a   : > { %1836 = vmatpush1.bf16.msra.mxu0 %v1835_v44 }
  0x4b   : > { %1838 = vmatprep.subr.bf16.mxu0 %v1837_v45 }
  0x4e   : > { %1840 = vmatpush1.bf16.msra.mxu0 %v1839_v48 }
  0x4f   : > { %1850 = vmatprep.subr.bf16.mxu0 %v1841_v54 }
  0x51   : > { %470 = vmatmul.mubr.f32.vlgmr.msra.gmra.mrb[0].mxu0 %v404_v49  ;;  %v620_v49 = vld [vmem:[%s2714_s3] sm:$0xff] }
  0x52   : > { %1852 = vmatpush3.bf16.msra.mxu0 %v1841_v54 }
 0x124   : > { %v471_v50 = vpop.f32.mrb[0].mxu0 }
 0x125   : > { %483 = vrot.lane.b32.xlu1 %v471_v50, %s2105_s22  ;;  %477 = vrot.lane.b32.xlu0 %v471_v50, %s2106_s23  ;;  %v2279_v51 = vpop.f32.mrb[1].mxu0 }
 0x129   : > { %486 = vrot.lane.b32.xlu1 %v471_v50, %s2107_s24  ;;  %480 = vrot.lane.b32.xlu0 %v471_v50, %s2108_s25 }
 0x12d   : > { %492 = vrot.lane.b32.xlu1 %v471_v50, %s2109_s26  ;;  %489 = vrot.lane.b32.xlu0 %v471_v50, %s2110_s28 }
 0x131   : > { %495 = vrot.lane.b32.xlu0 %v471_v50, %s2111_s29  ;;  %499 = vrot.lane.b32.xlu1 %v2279_v51, %s2106_s23  ;;  %s2299_s23 = sld [smem:[#allocation2 + $0x1]] }
 0x135   : > { %502 = vrot.lane.b32.xlu0 %v2279_v51, %s2108_s25  ;;  %505 = vrot.lane.b32.xlu1 %v2279_v51, %s2105_s22  ;;  %s2297_s22 = sld [smem:[#allocation2]]  ;;  %s371_s25 = scalar_lea.vmem %s2716_s5, %s1563_s14 }
 0x136   : > { %s2590_s14 = sand.u32 1, %s2093_s10  }
 0x137   : > { %v934_v28 = vstv %s2299_s23  ;;  %s1410_s16 = scalar_lea.sflag [#allocation3], %s2590_s14 }
 0x139   : > { %508 = vrot.lane.b32.xlu0 %v2279_v51, %s2107_s24  ;;  %511 = vrot.lane.b32.xlu1 %v2279_v51, %s2110_s28  ;;  %s1624_s24 = sshll.u32 %s2189_s13, 12 }
 0x13b   : > { %v639_v27 = vstv %s2297_s22  ;;  %s1560_s22 = sshll.u32 %s2590_s14, 8 }
 0x13c   : > { %s2593_s23 = scalar_lea.vmem [#allocation5], %s1560_s22 }
 0x13d   : > { %514 = vrot.lane.b32.xlu0 %v2279_v51, %s2109_s26  ;;  %517 = vrot.lane.b32.xlu1 %v2279_v51, %s2111_s29  ;;  %s1427_s27 = sshll.u32 %s2593_s23, 4  ;;  %s2628_s29 = scalar_lea.hbm %s2719_s8, %s1624_s24  ;;  %s2630_s27 = int_to_ptr.vmem [resolvable:$true] %s1427_s27 }
 0x13e   : > { %s2003_s17 = scalar_lea.vmem %s2630_s27, 4096 }
 0x13f   : > { %p2004_p9 = scmp.ne.s32.totalorder %s2630_s27, %s2003_s17 }
 0x141   : > { %p2005_p10 = pnand %p2004_p9, %p2206_p5 }
 0x143   : > { %p2006_p12 = pneg %p2005_p10 }
 0x197   : > { %v484_v55 = vpop.permute.xlu1 %483  ;;  %v478_v56 = vpop.permute.xlu0 %477 }
 0x198   : > { %v528_v6 = vcombine.low %v478_v56, %v484_v55 }
 0x19a   : > { %v535_v12 = vrot.slane %v528_v6, %v526_v5  ;;  %v1232_v6 = vld [vmem:[%s2717_s6 + $0x198] sm:$0xff] }
 0x19b   : > { %v487_v60 = vpop.permute.xlu1 %486  ;;  %v481_v61 = vpop.permute.xlu0 %480 }
 0x19c   : > { %v520_v0 = vcombine.low %v471_v50, %v481_v61  ;;  %v1197_v50 = vld [vmem:[%s2717_s6 + $0x80] sm:$0xff] }
 0x19d   : > { %v1181_v61 = vld [vmem:[%s2717_s6] sm:$0xff] }
 0x19e   : > { %v527_v7 = vrot.slane %v520_v0, %v526_v5  ;;  %v1889_v0 = vpack.c.bf16 %v1230_v53, %v1229_v52 }
 0x19f   : > { %v493_v3 = vpop.permute.xlu1 %492  ;;  %v490_v4 = vpop.permute.xlu0 %489 }
 0x1a0   : > { %v536_v8 = vcombine.low %v487_v60, %v493_v3  ;;  %v552_v14 = vcombine.low %v527_v7, %v535_v12  ;;  %v1199_v3 = vld [vmem:[%s2717_s6 + $0x90] sm:$0xff]  ;;  %v621_v7 = vld [vmem:[%s2714_s3 + $0x8] sm:$0xff] }
 0x1a1   : > { %v1183_v12 = vld [vmem:[%s2717_s6 + $0x10] sm:$0xff] }
 0x1a2   : > { %v543_v15 = vrot.slane %v536_v8, %v526_v5  ;;  %v559_v23 = vrot.slane %v552_v14, %v558_v17  ;;  %v1859_v8 = vpack.c.bf16 %v1182_v62, %v1181_v61  ;;  %v1215_v14 = vld [vmem:[%s2717_s6 + $0x110] sm:$0xff]  ;;  %v1240_v62 = vld [vmem:[%s2717_s6 + $0x1d8] sm:$0xff] }
 0x1a3   : > { %v496_v10 = vpop.permute.xlu0 %495  ;;  %v500_v11 = vpop.permute.xlu1 %499  ;;  %v1239_v61 = vld [vmem:[%s2717_s6 + $0x1d0] sm:$0xff] }
 0x1a4   : > { %v544_v13 = vcombine.low %v490_v4, %v496_v10  ;;  %v1200_v4 = vld [vmem:[%s2717_s6 + $0x98] sm:$0xff]  ;;  %v1891_v10 = vpack.c.bf16 %v1214_v2, %v1213_v1  ;;  %v630_v2 = vld [vmem:[%s2714_s3 + $0x50] sm:$0xff] }
 0x1a6   : > { %v551_v16 = vrot.slane %v544_v13, %v526_v5  ;;  %v1184_v13 = vld [vmem:[%s2717_s6 + $0x18] sm:$0xff] }
 0x1a7   : > { %v503_v18 = vpop.permute.xlu0 %502  ;;  %v506_v19 = vpop.permute.xlu1 %505 }
 0x1a8   : > { %v560_v20 = vcombine.low %v543_v15, %v551_v16  ;;  %v570_v21 = vcombine.low %v2279_v51, %v503_v18  ;;  %v578_v22 = vcombine.low %v500_v11, %v506_v19  ;;  %v1198_v51 = vld [vmem:[%s2717_s6 + $0x88] sm:$0xff]  ;;  %v1861_v11 = vpack.c.bf16 %v1200_v4, %v1199_v3  ;;  %v1216_v16 = vld [vmem:[%s2717_s6 + $0x118] sm:$0xff]  ;;  %v1233_v19 = vld [vmem:[%s2717_s6 + $0x1a0] sm:$0xff] }
 0x1a9   : > { %v1857_v60 = vpack.c.bf16 %v1198_v51, %v1197_v50  ;;  %v1202_v18 = vld [vmem:[%s2717_s6 + $0xa8] sm:$0xff]  ;;  %v628_v51 = vld [vmem:[%s2714_s3 + $0x40] sm:$0xff] }
 0x1aa   : > { %v567_v24 = vrot.slane %v560_v20, %v558_v17  ;;  %v577_v31 = vrot.slane %v570_v21, %v526_v5  ;;  %v585_v32 = vrot.slane %v578_v22, %v526_v5  ;;  %v1234_v20 = vld [vmem:[%s2717_s6 + $0x1a8] sm:$0xff]  ;;  %v623_v21 = vld [vmem:[%s2714_s3 + $0x18] sm:$0xff]  ;;  %v1863_v22 = vpack.c.bf16 %v1184_v13, %v1183_v12  ;;  %v1241_v12 = vld [vmem:[%s2717_s6 + $0x1e0] sm:$0xff] }
 0x1ab   : > { %v509_v25 = vpop.permute.xlu0 %508  ;;  %v512_v26 = vpop.permute.xlu1 %511  ;;  %v1242_v13 = vld [vmem:[%s2717_s6 + $0x1e8] sm:$0xff] }
 0x1ac   : > { %v568_v29 = vcombine.low %v559_v23, %v567_v24  ;;  %v569_v30 = vcombine.high %v559_v23, %v567_v24  ;;  %v602_v39 = vcombine.low %v577_v31, %v585_v32  ;;  %v624_v23 = vld [vmem:[%s2714_s3 + $0x20] sm:$0xff]  ;;  %v1895_v24 = vpack.c.bf16 %v1216_v16, %v1215_v14  ;;  %v1203_v31 = vld [vmem:[%s2717_s6 + $0xb0] sm:$0xff]  ;;  %v1204_v32 = vld [vmem:[%s2717_s6 + $0xb8] sm:$0xff] }
 0x1ad   : > { %v631_v14 = vld [vmem:[%s2714_s3 + $0x58] sm:$0xff]  ;;  %v632_v16 = vld [vmem:[%s2714_s3 + $0x60] sm:$0xff] }
 0x1ae   : > { %v640_v33 = vadd.f32 %v639_v27, %v568_v29  ;;  %v935_v34 = vadd.f32 %v934_v28, %v569_v30  ;;  %v609_v43 = vrot.slane %v602_v39, %v558_v17  ;;  %v1897_v29 = vpack.c.bf16 %v1234_v20, %v1233_v19  ;;  %v1218_v30 = vld [vmem:[%s2717_s6 + $0x128] sm:$0xff]  ;;  %v1193_v19 = vld [vmem:[%s2717_s6 + $0x60] sm:$0xff] }
 0x1af   : > { %v515_v35 = vpop.permute.xlu0 %514  ;;  %v518_v36 = vpop.permute.xlu1 %517  ;;  %v1869_v39 = vpack.c.bf16 %v1204_v32, %v1203_v31  ;;  %v1194_v20 = vld [vmem:[%s2717_s6 + $0x68] sm:$0xff]  ;;  %v1253_v31 = vsub.s32 1, %v2294_v63 }
 0x1b0   : > { %v586_v37 = vcombine.low %v509_v25, %v515_v35  ;;  %v594_v38 = vcombine.low %v512_v26, %v518_v36  ;;  %1743 = vmatprep.mubr.msk.f32.mxu1 %vm642_vm0, %v640_v33  ;;  %1778 = vmatprep.mubr.msk.f32.mxu0 %vm642_vm0, %v935_v34  ;;  %v1185_v26 = vld [vmem:[%s2717_s6 + $0x20] sm:$0xff]  ;;  %v1235_v33 = vld [vmem:[%s2717_s6 + $0x1b0] sm:$0xff]  ;;  %v1236_v34 = vld [vmem:[%s2717_s6 + $0x1b8] sm:$0xff] }
 0x1b1   : > { %v625_v35 = vld [vmem:[%s2714_s3 + $0x28] sm:$0xff] }
 0x1b2   : > { %v593_v40 = vrot.slane %v586_v37, %v526_v5  ;;  %v601_v41 = vrot.slane %v594_v38, %v526_v5  ;;  %v1231_v5 = vld [vmem:[%s2717_s6 + $0x190] sm:$0xff] }
 0x1b3   : > { %v1893_v15 = vpack.c.bf16 %v1232_v6, %v1231_v5  ;;  %v626_v37 = vld [vmem:[%s2714_s3 + $0x30] sm:$0xff]  ;;  %v1192_v6 = vld [vmem:[%s2717_s6 + $0x58] sm:$0xff] }
 0x1b4   : > { %v610_v42 = vcombine.low %v593_v40, %v601_v41  ;;  %v1187_v40 = vld [vmem:[%s2717_s6 + $0x30] sm:$0xff]  ;;  %v1188_v41 = vld [vmem:[%s2717_s6 + $0x38] sm:$0xff] }
 0x1b5   : > { %v1871_v50 = vpack.c.bf16 %v1188_v41, %v1187_v40  ;;  %v1191_v5 = vld [vmem:[%s2717_s6 + $0x50] sm:$0xff]  ;;  %v1228_v40 = vld [vmem:[%s2717_s6 + $0x178] sm:$0xff]  ;;  %v1249_v41 = vsub.s32 0, %v2294_v63 }
 0x1b6   : > { %v617_v44 = vrot.slane %v610_v42, %v558_v17  ;;  %v1201_v17 = vld [vmem:[%s2717_s6 + $0xa0] sm:$0xff]  ;;  %v1219_v42 = vld [vmem:[%s2717_s6 + $0x130] sm:$0xff] }
 0x1b7   : > { %v1865_v25 = vpack.c.bf16 %v1202_v18, %v1201_v17 }
 0x1b8   : > { %v619_v45 = vcombine.high %v609_v43, %v617_v44  ;;  %v618_v46 = vcombine.low %v609_v43, %v617_v44  ;;  %v1901_v43 = vpack.c.bf16 %v1236_v34, %v1235_v33  ;;  %v1220_v44 = vld [vmem:[%s2717_s6 + $0x138] sm:$0xff]  ;;  %v1195_v34 = vld [vmem:[%s2717_s6 + $0x70] sm:$0xff] }
 0x1b9   : > { %v1903_v52 = vpack.c.bf16 %v1220_v44, %v1219_v42  ;;  %v635_v42 = vld [vmem:[%s2714_s3 + $0x78] sm:$0xff] }
 0x1ba   : > { %v641_v47 = vadd.f32 %v639_v27, %v618_v46  ;;  %v936_v48 = vadd.f32 %v934_v28, %v619_v45  ;;  %v1186_v27 = vld [vmem:[%s2717_s6 + $0x28] sm:$0xff]  ;;  %v1217_v28 = vld [vmem:[%s2717_s6 + $0x120] sm:$0xff] }
 0x1bb   : > { %v1867_v36 = vpack.c.bf16 %v1186_v27, %v1185_v26  ;;  %v1899_v38 = vpack.c.bf16 %v1218_v30, %v1217_v28  ;;  %v1205_v45 = vld [vmem:[%s2717_s6 + $0xc0] sm:$0xff]  ;;  %v1206_v46 = vld [vmem:[%s2717_s6 + $0xc8] sm:$0xff]  ;;  %v1243_v26 = vld [vmem:[%s2717_s6 + $0x1f0] sm:$0xff] }
 0x1bc   : > { %1744 = vmatmul.mubr.msk.f32.vlgmr.msra.gmra.mrb[0].mxu1 %vm642_vm0, %v641_v47  ;;  %1779 = vmatmul.mubr.msk.f32.vlgmr.msra.gmra.mrb[2].mxu0 %vm642_vm0, %v936_v48  ;;  %v1237_v47 = vld [vmem:[%s2717_s6 + $0x1c0] sm:$0xff]  ;;  %v1238_v48 = vld [vmem:[%s2717_s6 + $0x1c8] sm:$0xff]  ;;  %v1873_v53 = vpack.c.bf16 %v1206_v46, %v1205_v45  ;;  %v1244_v27 = vld [vmem:[%s2717_s6 + $0x1f8] sm:$0xff]  ;;  %v1257_v45 = vsub.s32 2, %v2294_v63 }
 0x1bd   : > { %1750 = vmatprep.mubr.msk.f32.mxu1 %vm642_vm0, %v620_v49  ;;  %1785 = vmatprep.mubr.msk.f32.mxu0 %vm642_vm0, %v620_v49  ;;  %v627_v49 = vld [vmem:[%s2714_s3 + $0x38] sm:$0xff]  ;;  %v633_v28 = vld [vmem:[%s2714_s3 + $0x68] sm:$0xff]  ;;  %v634_v30 = vld [vmem:[%s2714_s3 + $0x70] sm:$0xff] }
 0x28f   : > { %v1745_v54 = vpop.f32.mrb[0].mxu1  ;;  %v1780_v55 = vpop.f32.mrb[2].mxu0 }
 0x290   : > { %v715_v56 = vpop.f32.mrb[1].mxu1  ;;  %v1009_v57 = vpop.f32.mrb[3].mxu0 }
 0x291   : > { %v1845_v58 = vpack.c.bf16 %v1745_v54, %v715_v56  ;;  %v1853_v59 = vpack.c.bf16 %v1780_v55, %v1009_v57  ;;  %v1189_v54 = vld [vmem:[%s2717_s6 + $0x40] sm:$0xff]  ;;  %v1190_v55 = vld [vmem:[%s2717_s6 + $0x48] sm:$0xff]  ;;  %v1905_v57 = vpack.c.bf16 %v1238_v48, %v1237_v47 }
 0x292   : > { %v1221_v56 = vld [vmem:[%s2717_s6 + $0x140] sm:$0xff]  ;;  %v1875_v1 = vpack.c.bf16 %v1190_v55, %v1189_v54 }
 0x293   : > { %1846 = vmatprep.subr.bf16.mxu1 %v1845_v58  ;;  %1854 = vmatprep.subr.bf16.mxu0 %v1853_v59 }
 0x294   : > { %1848 = vmatpush3.bf16.msra.mxu1 %v1845_v58  ;;  %1856 = vmatpush3.bf16.msra.mxu0 %v1853_v59  ;;  %v1222_v58 = vld [vmem:[%s2717_s6 + $0x148] sm:$0xff]  ;;  %v1207_v59 = vld [vmem:[%s2717_s6 + $0xd0] sm:$0xff] }
 0x295   : > { %1858 = vmatprep.subr.bf16.mxu1 %v1857_v60  ;;  %1890 = vmatprep.subr.bf16.mxu0 %v1889_v0  ;;  %v1208_v60 = vld [vmem:[%s2717_s6 + $0xd8] sm:$0xff]  ;;  %v629_v0 = vld [vmem:[%s2714_s3 + $0x48] sm:$0xff]  ;;  %v1907_v3 = vpack.c.bf16 %v1222_v58, %v1221_v56 }
 0x296   : > { %v1877_v4 = vpack.c.bf16 %v1208_v60, %v1207_v59 }
 0x297   : > { %1751 = vmatmul.mubr.msk.f32.vlgmr.msra.gmra.mrb[2].mxu1 %vm642_vm0, %v621_v7  ;;  %1786 = vmatmul.mubr.msk.f32.vlgmr.msra.gmra.mrb[4].mxu0 %vm642_vm0, %v621_v7  ;;  %v1223_v7 = vld [vmem:[%s2717_s6 + $0x150] sm:$0xff] }
 0x298   : > { %1860 = vmatpush3.bf16.msra.mxu1 %v1859_v8  ;;  %1753 = vmatprep.mubr.msk.f32.mxu1 %vm642_vm0, %v622_v9  ;;  %v1909_v8 = vpack.c.bf16 %v1240_v62, %v1239_v61 }
 0x299   : > { %1892 = vmatpush3.bf16.msra.mxu0 %v1891_v10  ;;  %1862 = vmatprep.subr.bf16.mxu1 %v1861_v11  ;;  %v1209_v10 = vld [vmem:[%s2717_s6 + $0xe0] sm:$0xff]  ;;  %v1210_v11 = vld [vmem:[%s2717_s6 + $0xe8] sm:$0xff] }
 0x29a   : > { %1788 = vmatprep.mubr.msk.f32.mxu0 %vm642_vm0, %v622_v9  ;;  %1894 = vmatprep.subr.bf16.mxu0 %v1893_v15  ;;  %v1224_v9 = vld [vmem:[%s2717_s6 + $0x158] sm:$0xff]  ;;  %v1879_v15 = vpack.c.bf16 %v1192_v6, %v1191_v5  ;;  %v1881_v18 = vpack.c.bf16 %v1210_v11, %v1209_v10 }
 0x29b   : > { %1754 = vmatmul.mubr.msk.f32.gmra.mrb[4].mxu1 %vm642_vm0, %v623_v21  ;;  %1789 = vmatmul.mubr.msk.f32.gmra.mrb[6].mxu0 %vm642_vm0, %v623_v21  ;;  %v1911_v17 = vpack.c.bf16 %v1224_v9, %v1223_v7  ;;  %v1225_v21 = vld [vmem:[%s2717_s6 + $0x160] sm:$0xff] }
 0x29c   : > { %1864 = vmatpush3.bf16.msra.mxu1 %v1863_v22  ;;  %1756 = vmatprep.mubr.msk.f32.mxu1 %vm642_vm0, %v624_v23  ;;  %v1913_v22 = vpack.c.bf16 %v1242_v13, %v1241_v12 }
 0x29d   : > { %1896 = vmatpush3.bf16.msra.mxu0 %v1895_v24  ;;  %1866 = vmatprep.subr.bf16.mxu1 %v1865_v25  ;;  %v1211_v24 = vld [vmem:[%s2717_s6 + $0xf0] sm:$0xff]  ;;  %v1212_v25 = vld [vmem:[%s2717_s6 + $0xf8] sm:$0xff] }
 0x29e   : > { %1791 = vmatprep.mubr.msk.f32.mxu0 %vm642_vm0, %v624_v23  ;;  %1898 = vmatprep.subr.bf16.mxu0 %v1897_v29  ;;  %v1226_v23 = vld [vmem:[%s2717_s6 + $0x168] sm:$0xff]  ;;  %v1883_v29 = vpack.c.bf16 %v1194_v20, %v1193_v19  ;;  %v1885_v33 = vpack.c.bf16 %v1212_v25, %v1211_v24 }
 0x29f   : > { %1757 = vmatmul.mubr.msk.f32.gmra.mrb[6].mxu1 %vm642_vm0, %v625_v35  ;;  %1792 = vmatmul.mubr.msk.f32.gmra.mrb[8].mxu0 %vm642_vm0, %v625_v35  ;;  %v1915_v32 = vpack.c.bf16 %v1226_v23, %v1225_v21  ;;  %v1196_v35 = vld [vmem:[%s2717_s6 + $0x78] sm:$0xff] }
 0x2a0   : > { %1868 = vmatpush3.bf16.msra.mxu1 %v1867_v36  ;;  %1759 = vmatprep.mubr.msk.f32.mxu1 %vm642_vm0, %v626_v37  ;;  %v1180_v36 = vld [vmem:[%s371_s25] sm:$0xf]  ;;  %s2114_s25 = smov [#allocation5]  }
 0x2a1   : > { %1900 = vmatpush3.bf16.msra.mxu0 %v1899_v38  ;;  %1870 = vmatprep.subr.bf16.mxu1 %v1869_v39  ;;  %v1917_v38 = vpack.c.bf16 %v1244_v27, %v1243_v26  ;;  %v1227_v39 = vld [vmem:[%s2717_s6 + $0x170] sm:$0xff]  ;;  %v1254_v44 = vrot.slane %v1180_v36, %v1253_v31  ;;  %v1250_v48 = vrot.slane %v1180_v36, %v1249_v41  ;;  %s2007_s21 = sshll.u32 %s2114_s25, 4  ;;  %s2008_s21 = int_to_ptr.vmem [resolvable:$false] %s2007_s21 }
 0x2a2   : > { %1794 = vmatprep.mubr.msk.f32.mxu0 %vm642_vm0, %v626_v37  ;;  %1902 = vmatprep.subr.bf16.mxu0 %v1901_v43  ;;  %v1261_v37 = vsub.s32 3, %v2294_v63  ;;  %v1887_v43 = vpack.c.bf16 %v1196_v35, %v1195_v34  ;;  %v1919_v46 = vpack.c.bf16 %v1228_v40, %v1227_v39  ;;  %s2009_s22 = scalar_lea.vmem %s2008_s21, 8192  ;;  %p2010_p13 = scmp.lt.s32.totalorder %s2630_s27, %s2008_s21 }
 0x2a3   : > { %1760 = vmatmul.mubr.msk.f32.gmra.mrb[8].mxu1 %vm642_vm0, %v627_v49  ;;  %1795 = vmatmul.mubr.msk.f32.gmra.mrb[10].mxu0 %vm642_vm0, %v627_v49  ;;  %v1258_v49 = vrot.slane %v1180_v36, %v1257_v45  ;;  %p2011_p0 = scmp.lt.s32.totalorder %s2009_s22, %s2003_s17 }
 0x2a4   : > { %1872 = vmatpush3.bf16.msra.mxu1 %v1871_v50  ;;  %1762 = vmatprep.mubr.msk.f32.mxu1 %vm642_vm0, %v628_v51  ;;  %v1262_v47 = vrot.slane %v1180_v36, %v1261_v37 }
 0x2a5   : > { %1904 = vmatpush3.bf16.msra.mxu0 %v1903_v52  ;;  %1874 = vmatprep.subr.bf16.mxu1 %v1873_v53  ;;  %p2012_p1 = por %p2011_p0, %p2010_p13 }
 0x2a6   : > { %1797 = vmatprep.mubr.msk.f32.mxu0 %vm642_vm0, %v628_v51  ;;  %1906 = vmatprep.subr.bf16.mxu0 %v1905_v57 }
 0x2a7   : > { %1763 = vmatmul.mubr.msk.f32.gmra.mrb[10].mxu1 %vm642_vm0, %v629_v0  ;;  %1798 = vmatmul.mubr.msk.f32.gmra.mrb[12].mxu0 %vm642_vm0, %v629_v0  ;;  %p2013_p2 = pnand %p2012_p1, %p2006_p12 }
 0x2a8   : > { %1876 = vmatpush3.bf16.msra.mxu1 %v1875_v1  ;;  %1765 = vmatprep.mubr.msk.f32.mxu1 %vm642_vm0, %v630_v2 }
 0x2a9   : > { %1908 = vmatpush3.bf16.msra.mxu0 %v1907_v3  ;;  %1878 = vmatprep.subr.bf16.mxu1 %v1877_v4 }
 0x2aa   : > { %1800 = vmatprep.mubr.msk.f32.mxu0 %vm642_vm0, %v630_v2  ;;  %1910 = vmatprep.subr.bf16.mxu0 %v1909_v8 }
 0x2ab   : > { %1766 = vmatmul.mubr.msk.f32.gmra.mrb[12].mxu1 %vm642_vm0, %v631_v14  ;;  %1801 = vmatmul.mubr.msk.f32.gmra.mrb[14].mxu0 %vm642_vm0, %v631_v14 }
 0x2ac   : > { %1880 = vmatpush3.bf16.msra.mxu1 %v1879_v15  ;;  %1768 = vmatprep.mubr.msk.f32.mxu1 %vm642_vm0, %v632_v16 }
 0x2ad   : > { %1912 = vmatpush3.bf16.msra.mxu0 %v1911_v17  ;;  %1882 = vmatprep.subr.bf16.mxu1 %v1881_v18 }
 0x2ae   : > { %1803 = vmatprep.mubr.msk.f32.mxu0 %vm642_vm0, %v632_v16  ;;  %1914 = vmatprep.subr.bf16.mxu0 %v1913_v22 }
 0x2af   : > { %1769 = vmatmul.mubr.msk.f32.gmra.mrb[14].mxu1 %vm642_vm0, %v633_v28  ;;  %1804 = vmatmul.mubr.msk.f32.gmra.mrb[16].mxu0 %vm642_vm0, %v633_v28 }
 0x2b0   : > { %1884 = vmatpush3.bf16.msra.mxu1 %v1883_v29  ;;  %1771 = vmatprep.mubr.msk.f32.mxu1 %vm642_vm0, %v634_v30 }
 0x2b1   : > { %1916 = vmatpush3.bf16.msra.mxu0 %v1915_v32  ;;  %1886 = vmatprep.subr.bf16.mxu1 %v1885_v33 }
 0x2b2   : > { %1806 = vmatprep.mubr.msk.f32.mxu0 %vm642_vm0, %v634_v30  ;;  %1918 = vmatprep.subr.bf16.mxu0 %v1917_v38 }
 0x2b3   : > { %1772 = vmatmul.mubr.msk.f32.gmra.mrb[16].mxu1 %vm642_vm0, %v635_v42  ;;  %1807 = vmatmul.mubr.msk.f32.gmra.mrb[18].mxu0 %vm642_vm0, %v635_v42 }
 0x2b4   : > { %1888 = vmatpush3.bf16.msra.mxu1 %v1887_v43  ;;  %1331 = vmatprep.mubr.f32.mxu1 %v1254_v44 }
 0x2b5   : > { %1920 = vmatpush3.bf16.msra.mxu0 %v1919_v46  ;;  %1401 = vmatprep.mubr.f32.mxu0 %v1262_v47 }
 0x2b7   : > { %1332 = vmatmul.mubr.f32.vlgmr.msra.gmra.mrb[18].mxu1 %v1250_v48 }
 0x2b8   : > { %1402 = vmatmul.mubr.f32.vlgmr.msra.gmra.mrb[20].mxu0 %v1258_v49 }
 0x36a   : > { %v1752_v63 = vpop.f32.mrb[2].mxu1  ;;  %v1787_v50 = vpop.f32.mrb[4].mxu0 }
 0x36b   : > { %918 = vst [vmem:[%s2593_s23 + $0x8] sm:$0xff] %v1752_v63  ;;  %v838_v51 = vpop.f32.mrb[3].mxu1  ;;  %1602 = vst [vmem:[%s2593_s23 + $0x88] sm:$0xff] %v1787_v50  ;;  %v1084_v52 = vpop.f32.mrb[5].mxu0 }
 0x36c   : > { %917 = vst [vmem:[%s2593_s23] sm:$0xff] %v838_v51  ;;  %1601 = vst [vmem:[%s2593_s23 + $0x80] sm:$0xff] %v1084_v52 }
 0x36e   : > { %v1755_v53 = vpop.f32.mrb[4].mxu1  ;;  %v1790_v54 = vpop.f32.mrb[6].mxu0 }
 0x36f   : > { %920 = vst [vmem:[%s2593_s23 + $0x18] sm:$0xff] %v1755_v53  ;;  %v848_v55 = vpop.f32.mrb[5].mxu1  ;;  %1604 = vst [vmem:[%s2593_s23 + $0x98] sm:$0xff] %v1790_v54  ;;  %v1094_v56 = vpop.f32.mrb[7].mxu0 }
 0x370   : > { %919 = vst [vmem:[%s2593_s23 + $0x10] sm:$0xff] %v848_v55  ;;  %1603 = vst [vmem:[%s2593_s23 + $0x90] sm:$0xff] %v1094_v56 }
 0x372   : > { %v1758_v57 = vpop.f32.mrb[6].mxu1  ;;  %v1793_v58 = vpop.f32.mrb[8].mxu0 }
 0x373   : > { %922 = vst [vmem:[%s2593_s23 + $0x28] sm:$0xff] %v1758_v57  ;;  %v858_v59 = vpop.f32.mrb[7].mxu1  ;;  %1606 = vst [vmem:[%s2593_s23 + $0xa8] sm:$0xff] %v1793_v58  ;;  %v1104_v60 = vpop.f32.mrb[9].mxu0 }
 0x374   : > { %921 = vst [vmem:[%s2593_s23 + $0x20] sm:$0xff] %v858_v59  ;;  %1605 = vst [vmem:[%s2593_s23 + $0xa0] sm:$0xff] %v1104_v60 }
 0x376   : > { %v1761_v61 = vpop.f32.mrb[8].mxu1  ;;  %v1796_v62 = vpop.f32.mrb[10].mxu0 }
 0x377   : > { %924 = vst [vmem:[%s2593_s23 + $0x38] sm:$0xff] %v1761_v61  ;;  %v868_v0 = vpop.f32.mrb[9].mxu1  ;;  %1608 = vst [vmem:[%s2593_s23 + $0xb8] sm:$0xff] %v1796_v62  ;;  %v1114_v1 = vpop.f32.mrb[11].mxu0 }
 0x378   : > { %923 = vst [vmem:[%s2593_s23 + $0x30] sm:$0xff] %v868_v0  ;;  %1607 = vst [vmem:[%s2593_s23 + $0xb0] sm:$0xff] %v1114_v1 }
 0x37a   : > { %v1764_v2 = vpop.f32.mrb[10].mxu1  ;;  %v1799_v3 = vpop.f32.mrb[12].mxu0 }
 0x37b   : > { %926 = vst [vmem:[%s2593_s23 + $0x48] sm:$0xff] %v1764_v2  ;;  %v878_v4 = vpop.f32.mrb[11].mxu1  ;;  %1610 = vst [vmem:[%s2593_s23 + $0xc8] sm:$0xff] %v1799_v3  ;;  %v1124_v5 = vpop.f32.mrb[13].mxu0 }
 0x37c   : > { %925 = vst [vmem:[%s2593_s23 + $0x40] sm:$0xff] %v878_v4  ;;  %1609 = vst [vmem:[%s2593_s23 + $0xc0] sm:$0xff] %v1124_v5 }
 0x37e   : > { %v1767_v6 = vpop.f32.mrb[12].mxu1  ;;  %v1802_v7 = vpop.f32.mrb[14].mxu0 }
 0x37f   : > { %928 = vst [vmem:[%s2593_s23 + $0x58] sm:$0xff] %v1767_v6  ;;  %v888_v8 = vpop.f32.mrb[13].mxu1  ;;  %1612 = vst [vmem:[%s2593_s23 + $0xd8] sm:$0xff] %v1802_v7  ;;  %v1134_v9 = vpop.f32.mrb[15].mxu0 }
 0x380   : > { %927 = vst [vmem:[%s2593_s23 + $0x50] sm:$0xff] %v888_v8  ;;  %1611 = vst [vmem:[%s2593_s23 + $0xd0] sm:$0xff] %v1134_v9 }
 0x382   : > { %v1770_v10 = vpop.f32.mrb[14].mxu1  ;;  %v1805_v11 = vpop.f32.mrb[16].mxu0 }
 0x383   : > { %930 = vst [vmem:[%s2593_s23 + $0x68] sm:$0xff] %v1770_v10  ;;  %v898_v12 = vpop.f32.mrb[15].mxu1  ;;  %1614 = vst [vmem:[%s2593_s23 + $0xe8] sm:$0xff] %v1805_v11  ;;  %v1144_v13 = vpop.f32.mrb[17].mxu0 }
 0x384   : > { %929 = vst [vmem:[%s2593_s23 + $0x60] sm:$0xff] %v898_v12  ;;  %1613 = vst [vmem:[%s2593_s23 + $0xe0] sm:$0xff] %v1144_v13 }
 0x386   : > { %v1773_v14 = vpop.f32.mrb[16].mxu1  ;;  %v1808_v15 = vpop.f32.mrb[18].mxu0 }
 0x387   : > { %932 = vst [vmem:[%s2593_s23 + $0x78] sm:$0xff] %v1773_v14  ;;  %v908_v16 = vpop.f32.mrb[17].mxu1  ;;  %1616 = vst [vmem:[%s2593_s23 + $0xf8] sm:$0xff] %v1808_v15  ;;  %v1154_v17 = vpop.f32.mrb[19].mxu0 }
 0x388   : > { %931 = vst [vmem:[%s2593_s23 + $0x70] sm:$0xff] %v908_v16  ;;  %1615 = vst [vmem:[%s2593_s23 + $0xf0] sm:$0xff] %v1154_v17 }
 0x389   : > { %2016 = shalt.err (!%p2013_p2)
}
 0x38a   : > { %s2017_s23 = scalar_lea.hbm %s2628_s29, 4096  ;;  %s2021_s28 = scalar_lea.hbm %s2719_s8, 8192 }
 0x38b   : > { %p2018_p3 = scmp.ne.s32.totalorder %s2628_s29, %s2017_s23  ;;  %p2022_p8 = scmp.lt.u32.totalorder %s2628_s29, %s2719_s8 }
 0x38c   : > { %p2023_p11 = scmp.lt.u32.totalorder %s2021_s28, %s2017_s23  ;;  %p2025_p10 = scmp.lt.u32.totalorder %s2017_s23, %s2628_s29 }
 0x38d   : > { %p2019_p4 = pnand %p2018_p3, %p2206_p5 }
 0x38e   : > { %p2024_p9 = por %p2023_p11, %p2022_p8 }
 0x38f   : > { %p2020_p7 = pneg %p2019_p4 }
 0x390   : > { %p2026_p12 = por %p2025_p10, %p2024_p9 }
 0x392   : > { %p2027_p13 = pnand %p2026_p12, %p2020_p7 }
 0x394   : > { %2030 = shalt.err (!%p2027_p13)
}
 0x395   : > { %s2115_s17 = smov 128   ;;  %s2116_s22 = smov 8   ;;  %v1701_v18 = vpop.f32.mrb[18].mxu1  ;;  %v1245_v19 = vld [vmem:[%s2718_s7] sm:$0x1]  ;;  %v1736_v21 = vpop.f32.mrb[20].mxu0 }
 0x396   : > { %1925 = dma.vmem_to_hbm [thread:$0]  (%p2206_p5), %s2630_s27, 4096, %s2628_s29, %s1410_s16, %s2115_s17, %s2115_s17, %s2116_s22   ;;  %v1702_v20 = vpop.f32.mrb[19].mxu1  ;;  %v1737_v23 = vpop.f32.mrb[21].mxu0  ;;  %vm1407_vm1 = vcmask 8192  }
 0x397   : > { %v1703_v22 = vadd.f32 %v1702_v20, %v1701_v18  ;;  %v1738_v24 = vadd.f32 %v1737_v23, %v1736_v21  ;;  %s1620_s23 = sshll.u32 %s2189_s13, 4  ;;  %s362_s28 = scalar_lea.vmem [#allocation6], %s2590_s14 }
 0x398   : > { %s1443_s25 = sshll.u32 %s362_s28, 4  ;;  %s2668_s29 = scalar_lea.hbm %s2720_s9, %s1620_s23  ;;  %s2670_s25 = int_to_ptr.vmem [resolvable:$true] %s1443_s25 }
 0x399   : > { %v1334_v25 = vadd.f32 %v1703_v22, %v1245_v19  ;;  %s1415_s16 = scalar_lea.sflag [#allocation7], %s2590_s14  ;;  %s2031_s17 = scalar_lea.vmem %s2670_s25, 16 }
 0x39a   : > { %p2032_p0 = scmp.ne.s32.totalorder %s2670_s25, %s2031_s17  ;;  %s2117_s13 = smov [#allocation6]  }
 0x39b   : > { %v1404_v26 = vadd.f32 %v1738_v24, %v1334_v25  ;;  %s2035_s22 = sshll.u32 %s2117_s13, 4  ;;  %s2036_s22 = int_to_ptr.vmem [resolvable:$false] %s2035_s22 }
 0x39c   : > { %p2033_p1 = pnand %p2032_p0, %p2206_p5  ;;  %s2037_s24 = scalar_lea.vmem %s2036_s22, 32 }
 0x39d   : > { %1408 = vst.msk [vmem:[%s362_s28] sm:$0x1] %vm1407_vm1, %v1404_v26  ;;  %p2038_p3 = scmp.lt.s32.totalorder %s2670_s25, %s2036_s22  ;;  %p2039_p4 = scmp.lt.s32.totalorder %s2037_s24, %s2031_s17 }
 0x39e   : > { %p2034_p2 = pneg %p2033_p1 }
 0x39f   : > { %p2040_p7 = por %p2039_p4, %p2038_p3 }
 0x3a1   : > { %p2041_p8 = pnand %p2040_p7, %p2034_p2 }
 0x3a3   : > { %2044 = shalt.err (!%p2041_p8)
}
 0x3a4   : > { %s2045_s14 = scalar_lea.hbm %s2668_s29, 16  ;;  %s2049_s28 = scalar_lea.hbm %s2720_s9, 32 }
 0x3a5   : > { %p2046_p11 = scmp.ne.s32.totalorder %s2668_s29, %s2045_s14  ;;  %p2050_p12 = scmp.lt.u32.totalorder %s2668_s29, %s2720_s9 }
 0x3a6   : > { %p2051_p13 = scmp.lt.u32.totalorder %s2049_s28, %s2045_s14  ;;  %p2053_p1 = scmp.lt.u32.totalorder %s2045_s14, %s2668_s29 }
 0x3a7   : > { %p2047_p9 = pnand %p2046_p11, %p2206_p5 }
 0x3a8   : > { %p2052_p0 = por %p2051_p13, %p2050_p12 }
 0x3a9   : > { %p2048_p10 = pneg %p2047_p9 }
 0x3aa   : > { %p2054_p2 = por %p2053_p1, %p2052_p0 }
 0x3ac   : > { %p2055_p3 = pnand %p2054_p2, %p2048_p10 }
 0x3ae   : > { %2058 = shalt.err (!%p2055_p3)
}
 0x3af   : > { %1926 = dma.vmem_to_hbm [thread:$0]  (%p2206_p5), %s2670_s25, 16, %s2668_s29, %s1415_s16  }
 0x3b0 PF: > { %p1942_p4 = scmp.ge.s32.totalorder %s2101_s12, 2  ;;  %s1455_s17 = sand.u32 1, %s2089_s30  }
 0x3b1   : > { %s1456_s13 = scalar_lea.sflag [#allocation3], %s1455_s17 }
 0x3b2   : > { %p1934_p7 = pnand %p1942_p4, %p2210_p6 }
 0x3b4   : > { %2080 = dma.done.wait (!%p1934_p7), %s1456_s13, 4096  }
 0x3b5   : > { %2082 = vsyncadd (!%p1934_p7), %s1456_s13, 4294963200  ;;  %s1465_s22 = scalar_lea.sflag [#allocation7], %s1455_s17 }
 0x3b6   : > { %2084 = dma.done.wait (!%p1934_p7), %s1465_s22, 16  }
 0x3b7   : > { %2086 = vsyncadd (!%p1934_p7), %s1465_s22, 4294967280  ;;  %p24_p5 = scmp.ge.s32.totalorder %s2193_s15, 4   ;;  %s2724_s30 = smov %s2093_s10 }
 0x3b8   : > { %s2725_s10 = smov %s2097_s11  ;;  %s2726_s11 = smov %s2204_s18 }
 0x3b9   : > { %s2727_s12 = smov %s2193_s15  ;;  %26 = sbr.rel (!%p24_p5) target bundleno = 6 (0x6), region = 113 }
 0x3c0   :  { %1469 = vsyncpa [#allocation3], 1 }
 0x3c1   :  { %1471 = vsyncpa [#allocation3 + $0x1], 1 }
 0x3c2   :  { %1472 = vsyncpa [#allocation7], 1 }
 0x3c3   :  { %1474 = vsyncpa [#allocation7 + $0x1], 1 }
 0x3c4   :  { %1475 = vsyncpa [#allocation4], 1 }
 0x3c5   :  { %1477 = vsyncpa [#allocation4 + $0x1], 1 }

</bundles_post_ra>
